<compile_context>
chip_gen: v7x
topology: tpu7x:2x2x1
jax: 0.10.0
libtpu: 0.0.40
codegen_flags: <defaults>
</compile_context>

<pallas_src>
import jax
import jax.numpy as jnp
from jax.experimental import pallas as pl
from jax.experimental.pallas import tpu as pltpu


def _relu_kernel(x2_ref, o_ref):
    # Elementwise relu on the full (whole-array) VMEM-resident block: a single
    # VPU maximum over one (partial) vreg.
    o_ref[...] = jnp.maximum(x2_ref[...], 0.0)


def _relu_pallas(x2):
    return pl.pallas_call(
        _relu_kernel,
        out_shape=jax.ShapeDtypeStruct(x2.shape, x2.dtype),
        in_specs=[pl.BlockSpec(memory_space=pltpu.MemorySpace.VMEM)],
        out_specs=pl.BlockSpec(memory_space=pltpu.MemorySpace.VMEM),
        cost_estimate=pl.CostEstimate(
            flops=4, transcendentals=0, bytes_accessed=32
        ),
    )(x2)


@jax.jit
def model_forward(x1, x2):
    """Reproduces Model.forward: ignores x1, returns relu(x2)."""
    del x1  # unused, matching the PyTorch module exactly
    return _relu_pallas(x2)


if __name__ == "__main__":
    key = jax.random.PRNGKey(0)

    # x1: arbitrary input (the module never uses it). Small shape.
    x1 = jax.random.normal(key, (2, 4, 16, 16), dtype=jnp.float32)

    # x2: deterministic parameter from the module's __init__: torch.eye(2).
    x2 = jnp.eye(2, dtype=jnp.float32)

    out = model_forward(x1, x2)
    out = jax.block_until_ready(out)

    # Sanity check against the reference semantics: relu(eye(2)) == eye(2).
    assert out.shape == (2, 2), out.shape
    assert out.dtype == jnp.float32, out.dtype
    assert jnp.allclose(out, jnp.maximum(x2, 0.0)), out

    print("KERNEL_OK")
</pallas_src>

<mosaic_0001>
module attributes {stable_mosaic.version = 11 : i64} {
  func.func @_relu_kernel(%arg0: memref<2x2xf32, #tpu.memory_space<vmem>>, %arg1: memref<2x2xf32, #tpu.memory_space<vmem>>) attributes {dimension_semantics = [], scalar_prefetch = 0 : i64, scratch_operands = 0 : i64, tpu.core_type = #tpu.core_type<tc>} {
    %c0 = arith.constant 0 : index
    %c0_0 = arith.constant 0 : index
    %0 = vector.load %arg0[%c0, %c0_0] : memref<2x2xf32, #tpu.memory_space<vmem>>, vector<2x2xf32>
    %cst = arith.constant 0.000000e+00 : f32
    %1 = vector.broadcast %cst : f32 to vector<2x2xf32>
    %2 = arith.maximumf %0, %1 : vector<2x2xf32>
    %c0_1 = arith.constant 0 : index
    %c0_2 = arith.constant 0 : index
    %3 = vector.load %arg1[%c0_1, %c0_2] : memref<2x2xf32, #tpu.memory_space<vmem>>, vector<2x2xf32>
    tpu.vector_store %arg1[%c0_1, %c0_2], %2 {strides = array<i32>} : memref<2x2xf32, #tpu.memory_space<vmem>>, vector<2x2xf32>,
    return
  }
}

</mosaic_0001>

<bundles_post_ra>
// kernel: model_forward.1
= control target key start
LH: loop header
LB: loop body
LE: loop exit
PB: predicated region body
PF: predicated region fallthrough
CT: control target
= control target key end

     0   :  { %6 = vsyncpa [#allocation3], 0  ;;  %s126_s0 = inlined_call_operand.hbm [shape: f32[2,2], index: 0, kind: input, shape index: {}]   ;;  %s127_s1 = inlined_call_operand.hbm [shape: f32[2,2], index: 1, kind: output, shape index: {}]  }
   0x1   :  { %7 = vsyncpa [#allocation4], 0  ;;  %s90_s6 = smov [#allocation2]   ;;  %s42_s10 = scalar_lea.hbm %s126_s0, 32 }
   0x2   :  { %s14_s7 = sshll.u32 %s90_s6, 4  ;;  %p43_p0 = scmp.ne.s32.totalorder %s126_s0, %s42_s10  ;;  %s15_s7 = int_to_ptr.vmem [resolvable:$true] %s14_s7 }
   0x3   :  { %p46_p1 = scmp.lt.u32.totalorder %s42_s10, %s126_s0 }
   0x5   :  { %p48_p2 = pnand %p46_p1, %p43_p0 }
   0x7   :  { %51 = shalt.err (!%p48_p2)
}
   0x8   :  { %s52_s15 = scalar_lea.vmem %s15_s7, 32  ;;  %p57_p4 = scmp.lt.s32.totalorder %s15_s7, %s15_s7 }
   0x9   :  { %p53_p3 = scmp.ne.s32.totalorder %s15_s7, %s52_s15  ;;  %p58_p5 = scmp.lt.s32.totalorder %s52_s15, %s52_s15 }
   0xb   :  { %p59_p6 = por %p58_p5, %p57_p4 }
   0xd   :  { %p60_p7 = pnand %p59_p6, %p53_p3 }
   0xf   :  { %63 = shalt.err (!%p60_p7)
}
  0x10   :  { %17 = dma.hbm_to_vmem [thread:$0]  %s126_s0, 32, %s15_s7, [#allocation3]  }
  0x11   :  { %86 = dma.done.wait [#allocation3], 32  }
  0x12   :  { %87 = vsyncadd [#allocation3], 4294967264  ;;  %s91_s18 = smov [#allocation5]   ;;  %v21_v0 = vld [vmem:[#allocation2] sm:$0x3]  ;;  %vm23_vm0 = vcmask 9216  }
  0x13   :  { %s31_s19 = sshll.u32 %s91_s18, 4  ;;  %v22_v1 = vmax.f32 %v21_v0, 0.0  ;;  %s32_s19 = int_to_ptr.vmem [resolvable:$true] %s31_s19 }
  0x14   :  { %s64_s20 = scalar_lea.vmem %s32_s19, 32  ;;  %p69_p9 = scmp.lt.s32.totalorder %s32_s19, %s32_s19 }
  0x15   :  { %24 = vst.msk [vmem:[#allocation5] sm:$0x3] %vm23_vm0, %v22_v1  ;;  %p65_p8 = scmp.ne.s32.totalorder %s32_s19, %s64_s20  ;;  %p70_p10 = scmp.lt.s32.totalorder %s64_s20, %s64_s20 }
  0x17   :  { %p71_p11 = por %p70_p10, %p69_p9 }
  0x19   :  { %p72_p12 = pnand %p71_p11, %p65_p8 }
  0x1b   :  { %75 = shalt.err (!%p72_p12)
}
  0x1c   :  { %s76_s0 = scalar_lea.hbm %s127_s1, 32 }
  0x1d   :  { %p77_p13 = scmp.ne.s32.totalorder %s127_s1, %s76_s0  ;;  %p80_p0 = scmp.lt.u32.totalorder %s76_s0, %s127_s1 }
  0x1f   :  { %p82_p1 = pnand %p80_p0, %p77_p13 }
  0x21   :  { %85 = shalt.err (!%p82_p1)
}
  0x22   :  { %34 = dma.vmem_to_hbm [thread:$0]  %s32_s19, 32, %s127_s1, [#allocation4]  }
  0x23   :  { %88 = dma.done.wait [#allocation4], 32  }
  0x24   :  { %89 = vsyncadd [#allocation4], 4294967264 }
  0x25   :  { %38 = vsyncpa [#allocation3], 1 }
  0x26   :  { %39 = vsyncpa [#allocation4], 1 }

</bundles_post_ra>
